<compile_context>
chip_gen: v6e
topology: v6e:2x2x1
jax: 0.10.0
libtpu: 0.0.40
codegen_flags: <defaults>
</compile_context>

<pallas_src>
from typing import NamedTuple

import jax
import jax.numpy as jnp
from jax.experimental import pallas as pl
from jax.experimental.pallas import tpu as pltpu


def _round_up(x, m):
    return ((x + m - 1) // m) * m


def _vmem_capacity_bytes():
    """Per-TensorCore VMEM capacity; conservative 64 MiB fallback (v7x)."""
    try:
        info = pltpu.get_tpu_info()
        cap = getattr(info, "vmem_capacity_bytes", None)
        if cap:
            return int(cap)
    except Exception:
        pass
    return 64 << 20


class SteerHeadParams(NamedTuple):
    """One-time prepared (frozen) parameters for the steered lm_head."""
    w_t: jax.Array       # (D, Vp)  lm_head weight, transposed + vocab-padded
    p1_flat: jax.Array   # (D, S*R) projector1 flattened
    p2_flat: jax.Array   # (S*R, D) projector2 flattened, scaled by epsilon
    vocab_size: int      # original (unpadded) V
    rank: int
    tn: int              # vocab tile width the weight was padded for


def prepare_steer_head(lm_head_w, projector1, projector2, *, epsilon,
                       tn=512, max_vocab_splits=2, compute_dtype=None):
    """One-time setup: layout transforms of the FROZEN weights (not per call).

    lm_head_w:    [V, D]
    projector1/2: [num_steers, D, rank]
    """
    V, D = lm_head_w.shape
    S, _, R = projector1.shape
    if compute_dtype is None:
        compute_dtype = lm_head_w.dtype

    tn = _round_up(min(tn, _round_up(V, 128)), 128)
    pad_to = tn * max(1, int(max_vocab_splits))
    Vp = _round_up(V, pad_to)

    # Transpose once so the kernel does a standard (tm, D) x (D, tn) contraction
    # (no per-tile transpose of a 4 MiB weight tile stealing the XLU slot).
    w_t = jnp.transpose(lm_head_w).astype(compute_dtype)          # (D, V)
    if Vp != V:
        w_t = jnp.pad(w_t, ((0, 0), (0, Vp - V)))                 # zero logits, sliced off

    # P1_flat[:, s*R + r] = P1[s, :, r];  P2_flat[s*R + r, :] = P2[s, :, r]
    p1_flat = jnp.transpose(projector1, (1, 0, 2)).reshape(D, S * R)
    p2_flat = jnp.transpose(projector2, (0, 2, 1)).reshape(S * R, D)
    p2_flat = p2_flat * jnp.asarray(epsilon, p2_flat.dtype)       # fold epsilon (frozen)

    return SteerHeadParams(w_t,
                           p1_flat.astype(compute_dtype),
                           p2_flat.astype(compute_dtype),
                           int(V), int(R), int(tn))


def _steer_lm_head_kernel(sv_ref, h_ref, p1_ref, p2_ref, w_ref,
                          logits_ref, proj_ref):
    """Grid = (vocab_splits, rows, vocab_tiles_per_split).

    The last axis (j) is SEQUENTIAL: at j == 0 the steered/projected hidden
    state for this (split, row-block) is computed once (f32 accumulation) into
    a VMEM scratch held in the lm_head compute dtype and reused for every
    vocab tile of the same row block.
    """
    j = pl.program_id(2)

    @pl.when(j == 0)
    def _():
        h = h_ref[...]                                             # (tm, D)
        # Low-rank steering folded into two wide matmuls (epsilon is in P2):
        #   tmp   = h @ P1_flat        -> (tm, S*R), f32 accumulate
        #   tmp  *= steer_values_exp   -> per-token/per-steer scale (f32)
        #   delta = tmp @ P2_flat_eps  -> (tm, D),  f32 accumulate
        tmp = jnp.dot(h, p1_ref[...], preferred_element_type=jnp.float32)
        tmp = tmp * sv_ref[...]
        p2 = p2_ref[...]
        delta = jnp.dot(tmp.astype(p2.dtype), p2,
                        preferred_element_type=jnp.float32)
        proj_ref[...] = (h.astype(jnp.float32) + delta).astype(proj_ref.dtype)

    # logits tile = projected @ W_t tile (standard (tm,D)x(D,tn) contraction).
    # Operands stay in the lm_head compute dtype (e.g. bf16) so the MXU runs
    # at full rate; accumulation is f32 via preferred_element_type.
    logits_ref[...] = jnp.dot(proj_ref[...], w_ref[...],
                              preferred_element_type=jnp.float32
                              ).astype(logits_ref.dtype)


def steered_lm_head(hidden, steer_values_tok, params: SteerHeadParams, *,
                    tm=1024, out_dtype=None, vocab_splits=None,
                    vmem_limit_bytes=None):
    """Projected_Adaptor forward (steered lm_head).

    hidden:            [N, D]           (N = B*T)
    steer_values_tok:  [N, num_steers]  (per-token steer values, set_value())
    params:            output of prepare_steer_head (frozen, reused per call)
    returns logits:    [N, V] in out_dtype (default: lm_head compute dtype)
    """
    N, D = hidden.shape
    S = steer_values_tok.shape[1]
    R = params.rank
    SR = S * R
    V = params.vocab_size
    Dw, Vp = params.w_t.shape
    assert Dw == D, "hidden dim mismatch with prepared lm_head weight"
    tn = params.tn
    compute_dtype = params.w_t.dtype
    if out_dtype is None:
        out_dtype = compute_dtype

    # ---- row tile plan: packed-sublane multiple of the compute dtype --------
    sub = max(8, 32 // jnp.dtype(compute_dtype).itemsize)   # 8 f32 / 16 bf16 / 32 i8
    tm = _round_up(min(tm, _round_up(N, sub)), sub)
    Np = _round_up(N, tm)
    rows = Np // tm

    # ---- per-call activation prep (cheap: N-sized, not V-sized) -------------
    hidden = hidden.astype(compute_dtype)
    sv_exp = jnp.repeat(steer_values_tok.astype(jnp.float32), R, axis=1)  # (N, S*R)
    if Np != N:
        hidden = jnp.pad(hidden, ((0, Np - N), (0, 0)))
        sv_exp = jnp.pad(sv_exp, ((0, Np - N), (0, 0)))

    # ---- vocab split (v7x decode: keep both TensorCores busy) ---------------
    n_vtiles = Vp // tn
    if vocab_splits is None:
        vocab_splits = 2 if (rows == 1 and n_vtiles >= 2 and n_vtiles % 2 == 0) else 1
    if vocab_splits < 1 or n_vtiles % vocab_splits != 0:
        vocab_splits = 1
    tiles_per_split = n_vtiles // vocab_splits

    # ---- honest VMEM budget (double buffering counted once) -----------------
    in_b = jnp.dtype(compute_dtype).itemsize
    sv_b = 4
    out_b = jnp.dtype(out_dtype).itemsize
    est = (2 * tm * D * in_b            # hidden (double buffered)
           + 2 * tm * SR * sv_b         # steer values
           + 2 * (D * SR + SR * D) * in_b  # projectors
           + 2 * D * tn * in_b          # W tile
           + 2 * tm * tn * out_b        # output tile
           + tm * D * in_b)             # projected-hidden scratch
    if vmem_limit_bytes is None:
        cap = _vmem_capacity_bytes()
        vmem_limit_bytes = int(min(max(int(est * 1.2) + (4 << 20), 32 << 20),
                                   int(0.9 * cap)))

    cost = pl.CostEstimate(
        flops=2 * Np * Vp * D + 4 * Np * SR * D * vocab_splits,
        transcendentals=0,
        bytes_accessed=(rows * Vp * D * in_b          # W streamed once per row block
                        + Np * D * in_b + Np * SR * sv_b + Np * Vp * out_b))

    w_map = lambda s, i, j: (0, s * tiles_per_split + j)
    out_map = lambda s, i, j: (i, s * tiles_per_split + j)

    out = pl.pallas_call(
        _steer_lm_head_kernel,
        out_shape=jax.ShapeDtypeStruct((Np, Vp), out_dtype),
        grid_spec=pltpu.PrefetchScalarGridSpec(
            num_scalar_prefetch=0,
            grid=(vocab_splits, rows, tiles_per_split),
            in_specs=[
                pl.BlockSpec((tm, SR), lambda s, i, j: (i, 0)),   # steer values (expanded)
                pl.BlockSpec((tm, D), lambda s, i, j: (i, 0)),    # hidden states
                pl.BlockSpec((D, SR), lambda s, i, j: (0, 0)),    # P1 flat
                pl.BlockSpec((SR, D), lambda s, i, j: (0, 0)),    # P2 flat (eps folded)
                pl.BlockSpec((D, tn), w_map),                     # W^T tile (D, tn)
            ],
            out_specs=pl.BlockSpec((tm, tn), out_map),
            scratch_shapes=[pltpu.VMEM((tm, D), compute_dtype)],  # projected h
        ),
        compiler_params=pltpu.CompilerParams(
            # Last axis must stay "arbitrary": proj scratch written at j==0,
            # reused for j>0 of the same (split, row block).
            dimension_semantics=("parallel", "parallel", "arbitrary"),
            vmem_limit_bytes=vmem_limit_bytes),
        cost_estimate=cost,
    )(sv_exp, hidden, params.p1_flat, params.p2_flat, params.w_t)

    if Np != N or Vp != V:
        out = out[:N, :V]   # mandatory: strips zero-logit padded vocab columns
    return out


if __name__ == "__main__":
    # Small, deterministic synthetic configuration.
    B, T = 2, 8                 # batch, sequence
    D = 64                      # embed_dim
    V = 1000                    # vocab size (not a multiple of 128: exercises setup padding)
    num_steers, rank = 2, 8
    epsilon, init_var = 1e-3, 1e-2

    key = jax.random.PRNGKey(0)
    k1, k2, k3, k4, k5, k6 = jax.random.split(key, 6)

    # Frozen "model" pieces (stand-ins for the HF checkpoint).
    embed_table = jax.random.normal(k1, (V, D), jnp.float32) * 0.02
    lm_head_w = jax.random.normal(k2, (V, D), jnp.float32) * 0.02

    # Projected_Adaptor parameters: randn * init_var (as in the module init).
    projector1 = jax.random.normal(k3, (num_steers, D, rank), jnp.float32) * init_var
    projector2 = jax.random.normal(k4, (num_steers, D, rank), jnp.float32) * init_var

    # Forward inputs: input_ids + steer_values (set_value + model forward).
    input_ids = jax.random.randint(k5, (B, T), 0, V)
    steer_values = jax.random.normal(k6, (B, num_steers), jnp.float32)

    # One-time setup (mirrors freezing + lm_head replacement in __init__).
    params = prepare_steer_head(lm_head_w, projector1, projector2, epsilon=epsilon)

    # Glue: embedding lookup stands in for the frozen transformer backbone.
    # TODO(synk): frozen HF transformer body is not a Pallas kernel here.
    hidden = embed_table[input_ids]                      # [B, T, D]
    hidden_flat = hidden.reshape(B * T, D)               # [N, D]
    sv_tok = jnp.repeat(steer_values, T, axis=0)         # [N, num_steers]

    logits = steered_lm_head(hidden_flat, sv_tok, params)
    logits = logits.reshape(B, T, V)
    jax.block_until_ready(logits)

    # Pure-JAX reference of the Projected_Adaptor forward (original per-steer form).
    tmp = jnp.einsum("nd,sdr->nsr", hidden_flat, projector1)
    delta = jnp.einsum("nsr,sdr->nsd", tmp, projector2)
    delta = (sv_tok[:, :, None] * delta).sum(axis=1)
    ref = (hidden_flat + epsilon * delta) @ lm_head_w.T
    assert jnp.allclose(logits.reshape(B * T, V), ref, atol=1e-4, rtol=1e-4)

    print("KERNEL_OK")
</pallas_src>

<mosaic_0001>
module attributes {stable_mosaic.version = 11 : i64} {
  func.func @_steer_lm_head_kernel(%arg0: i32, %arg1: i32, %arg2: i32, %arg3: memref<16x16xf32, #tpu.memory_space<vmem>>, %arg4: memref<16x64xf32, #tpu.memory_space<vmem>>, %arg5: memref<64x16xf32, #tpu.memory_space<vmem>>, %arg6: memref<16x64xf32, #tpu.memory_space<vmem>>, %arg7: memref<64x512xf32, #tpu.memory_space<vmem>>, %arg8: memref<16x512xf32, #tpu.memory_space<vmem>>, %arg9: memref<16x64xf32, #tpu.memory_space<vmem>>) attributes {dimension_semantics = [#tpu.dimension_semantics<parallel>, #tpu.dimension_semantics<parallel>, #tpu.dimension_semantics<arbitrary>], iteration_bounds = array<i64: 2, 1, 1>, scalar_prefetch = 0 : i64, scratch_operands = 1 : i64, tpu.core_type = #tpu.core_type<tc>, window_params = [{transform_indices = @transform_0, window_bounds = array<i64: 16, 16>}, {transform_indices = @transform_1, window_bounds = array<i64: 16, 64>}, {pipeline_mode = #tpu.pipeline_mode<synchronous>, transform_indices = @transform_2, window_bounds = array<i64: 64, 16>}, {pipeline_mode = #tpu.pipeline_mode<synchronous>, transform_indices = @transform_3, window_bounds = array<i64: 16, 64>}, {transform_indices = @transform_4, window_bounds = array<i64: 64, 512>}, {transform_indices = @transform_5, window_bounds = array<i64: 16, 512>}]} {
    %c0_i32 = arith.constant 0 : i32
    %0 = arith.cmpi eq, %arg2, %c0_i32 : i32
    %1 = arith.extui %0 : i1 to i32
    %c0_i32_0 = arith.constant 0 : i32
    %2 = arith.cmpi ne, %1, %c0_i32_0 : i32
    scf.if %2 {
      %c0_6 = arith.constant 0 : index
      %c0_7 = arith.constant 0 : index
      %7 = vector.load %arg4[%c0_6, %c0_7] : memref<16x64xf32, #tpu.memory_space<vmem>>, vector<16x64xf32>
      %c0_8 = arith.constant 0 : index
      %c0_9 = arith.constant 0 : index
      %8 = vector.load %arg5[%c0_8, %c0_9] : memref<64x16xf32, #tpu.memory_space<vmem>>, vector<64x16xf32>
      %cst_10 = arith.constant dense<0.000000e+00> : vector<16x16xf32>
      %9 = tpu.matmul %7, %8, %cst_10 {dimension_numbers = #tpu.dot_dimension_numbers<[1], [0], [0], [1], [0, 0, 1, 1], [], []>} : vector<16x64xf32>, vector<64x16xf32>, vector<16x16xf32> -> vector<16x16xf32>
      %c0_11 = arith.constant 0 : index
      %c0_12 = arith.constant 0 : index
      %10 = vector.load %arg3[%c0_11, %c0_12] : memref<16x16xf32, #tpu.memory_space<vmem>>, vector<16x16xf32>
      %11 = arith.mulf %9, %10 : vector<16x16xf32>
      %c0_13 = arith.constant 0 : index
      %c0_14 = arith.constant 0 : index
      %12 = vector.load %arg6[%c0_13, %c0_14] : memref<16x64xf32, #tpu.memory_space<vmem>>, vector<16x64xf32>
      %cst_15 = arith.constant dense<0.000000e+00> : vector<16x64xf32>
      %13 = tpu.matmul %11, %12, %cst_15 {dimension_numbers = #tpu.dot_dimension_numbers<[1], [0], [0], [1], [0, 0, 1, 1], [], []>} : vector<16x16xf32>, vector<16x64xf32>, vector<16x64xf32> -> vector<16x64xf32>
      %14 = arith.addf %7, %13 : vector<16x64xf32>
      %c0_16 = arith.constant 0 : index
      %c0_17 = arith.constant 0 : index
      %15 = vector.load %arg9[%c0_16, %c0_17] : memref<16x64xf32, #tpu.memory_space<vmem>>, vector<16x64xf32>
      tpu.vector_store %arg9[%c0_16, %c0_17], %14 {strides = array<i32>} : memref<16x64xf32, #tpu.memory_space<vmem>>, vector<16x64xf32>,
    } else {
    }
    %c0 = arith.constant 0 : index
    %c0_1 = arith.constant 0 : index
    %3 = vector.load %arg9[%c0, %c0_1] : memref<16x64xf32, #tpu.memory_space<vmem>>, vector<16x64xf32>
    %c0_2 = arith.constant 0 : index
    %c0_3 = arith.constant 0 : index
    %4 = vector.load %arg7[%c0_2, %c0_3] : memref<64x512xf32, #tpu.memory_space<vmem>>, vector<64x512xf32>
    %cst = arith.constant dense<0.000000e+00> : vector<16x512xf32>
    %5 = tpu.matmul %3, %4, %cst {dimension_numbers = #tpu.dot_dimension_numbers<[1], [0], [0], [1], [0, 0, 1, 1], [], []>} : vector<16x64xf32>, vector<64x512xf32>, vector<16x512xf32> -> vector<16x512xf32>
    %c0_4 = arith.constant 0 : index
    %c0_5 = arith.constant 0 : index
    %6 = vector.load %arg8[%c0_4, %c0_5] : memref<16x512xf32, #tpu.memory_space<vmem>>, vector<16x512xf32>
    tpu.vector_store %arg8[%c0_4, %c0_5], %5 {strides = array<i32>} : memref<16x512xf32, #tpu.memory_space<vmem>>, vector<16x512xf32>,
    return
  }
  func.func @transform_0(%arg0: i32, %arg1: i32, %arg2: i32) -> (i32, i32) {
    %c0_i32 = arith.constant 0 : i32
    %c0_i32_0 = arith.constant 0 : i32
    return %arg1, %c0_i32 : i32, i32
  }
  func.func @transform_1(%arg0: i32, %arg1: i32, %arg2: i32) -> (i32, i32) {
    %c0_i32 = arith.constant 0 : i32
    %c0_i32_0 = arith.constant 0 : i32
    return %arg1, %c0_i32 : i32, i32
  }
  func.func @transform_2(%arg0: i32, %arg1: i32, %arg2: i32) -> (i32, i32) {
    %c0_i32 = arith.constant 0 : i32
    %c0_i32_0 = arith.constant 0 : i32
    %c0_i32_1 = arith.constant 0 : i32
    return %c0_i32, %c0_i32_0 : i32, i32
  }
  func.func @transform_3(%arg0: i32, %arg1: i32, %arg2: i32) -> (i32, i32) {
    %c0_i32 = arith.constant 0 : i32
    %c0_i32_0 = arith.constant 0 : i32
    %c0_i32_1 = arith.constant 0 : i32
    return %c0_i32, %c0_i32_0 : i32, i32
  }
  func.func @transform_4(%arg0: i32, %arg1: i32, %arg2: i32) -> (i32, i32) {
    %c1_i32 = arith.constant 1 : i32
    %0 = arith.muli %arg0, %c1_i32 : i32
    %1 = arith.addi %0, %arg2 : i32
    %c0_i32 = arith.constant 0 : i32
    %c0_i32_0 = arith.constant 0 : i32
    return %c0_i32, %1 : i32, i32
  }
  func.func @transform_5(%arg0: i32, %arg1: i32, %arg2: i32) -> (i32, i32) {
    %c1_i32 = arith.constant 1 : i32
    %0 = arith.muli %arg0, %c1_i32 : i32
    %1 = arith.addi %0, %arg2 : i32
    %c0_i32 = arith.constant 0 : i32
    return %arg1, %1 : i32, i32
  }
}

</mosaic_0001>

<bundles_post_ra>
// kernel: tpu_custom_call.1
= control target key start
LH: loop header
LB: loop body
LE: loop exit
PB: predicated region body
PF: predicated region fallthrough
CT: control target
= control target key end

     0   :  { %10 = vsyncpa [#allocation4], 0  ;;  %s1368_s0 = inlined_call_operand.vmem [shape: f32[16,16], index: 0, kind: input, shape index: {}]   ;;  %s1369_s1 = inlined_call_operand.vmem [shape: f32[16,64], index: 1, kind: input, shape index: {}]   ;;  %s1370_s2 = inlined_call_operand.vmem [shape: f32[64,16], index: 2, kind: input, shape index: {}]   ;;  %s1371_s3 = inlined_call_operand.vmem [shape: f32[16,64], index: 3, kind: input, shape index: {}]   ;;  %s1372_s4 = inlined_call_operand.hbm [shape: f32[64,1024], index: 4, kind: input, shape index: {}]   ;;  %s1373_s5 = inlined_call_operand.hbm [shape: f32[16,1024], index: 5, kind: output, shape index: {}]  }
   0x1   :  { %12 = vsyncpa [#allocation4 + $0x1], 0 }
   0x2   :  { %13 = vsyncpa [#allocation5], 0 }
   0x3   :  { %15 = vsyncpa [#allocation5 + $0x1], 0  ;;  %s1131_s18 = smov 0   ;;  %s1133_s19 = smov 0  }
   0x4   :  { %s1135_s20 = smov 0   ;;  %s1137_s21 = smov 0  }
   0x5   :  { %s1139_s22 = smov 0   ;;  %s1141_s23 = smov 0  }
   0x6 LB: > { %s846_s24 = sadd.s32 4294967295, %s1090_s23   ;;  %s847_s25 = sadd.s32 4294967294, %s1090_s23   ;;  %s1090_s23 = sphi %s1141_s23, %s21_s23   ;;  %s1086_s22 = sphi %s1139_s22, %s1384_s22   ;;  %s1082_s21 = sphi %s1137_s21, %s1383_s21   ;;  %s1078_s20 = sphi %s1135_s20, %s1382_s20   ;;  %s1074_s19 = sphi %s1133_s19, %s1381_s19   ;;  %s1070_s18 = sphi %s1131_s18, %s1380_s18  }
   0x7   : > { %s40_s26 = sadd.s32 1, %s1086_s22  ;;  %s143_s27 = sadd.s32 1, %s1078_s20 }
   0x8   : > { %p42_p0 = scmp.ge.s32.totalorder %s40_s26, 2  ;;  %p150_p1 = scmp.ne.s32.totalorder %s1078_s20, %s1074_s19 }
   0x9   : > { %p151_p2 = scmp.eq.s32.totalorder %s1090_s23, 0  ;;  %p156_p3 = scmp.ne.s32.totalorder %s1074_s19, %s1070_s18 }
   0xa   : > { %s1386_s26 = smov (%p42_p0, %s40_s26), 0  ;;  %p157_p5 = scmp.eq.s32.totalorder %s846_s24, 0 }
   0xb   : > { %p1172_p4 = por %p151_p2, %p150_p1  ;;  %s140_s29 = ssub.s32 %s1086_s22, %s1386_s26 }
   0xc   : > { %p184_p6 = scmp.eq.s32.totalorder %s846_s24, 1  ;;  %p141_p7 = scmp.eq.s32.totalorder %s140_s29, 0 }
   0xd   : > { %p1178_p8 = por %p157_p5, %p156_p3  ;;  %p190_p10 = scmp.eq.s32.totalorder %s847_s25, 1 }
   0xe   : > { %p1182_p9 = por %p184_p6, %p150_p1  ;;  %p925_p13 = scmp.lt.s32.totalorder %s1090_s23, 2 }
   0xf   : > { %s1187_s7 = scalar_select %p141_p7, %s1078_s20, %s143_s27  }
  0x10   : > { %p1189_p11 = por %p190_p10, %p156_p3  ;;  %s234_s9 = sand.u32 1, %s1078_s20  }
  0x11   : > { %s852_s10 = sshll.u32 %s234_s9, 8  ;;  %s871_s11 = sshll.u32 %s1086_s22, 9 }
  0x12   : > { %s245_s14 = scalar_lea.hbm %s1372_s4, %s871_s11  ;;  %s238_s15 = scalar_lea.vmem [#allocation3], %s852_s10 }
  0x13   : > { %s246_s16 = sshll.u32 %s238_s15, 4  ;;  %p1202_p0 = pnand %p925_p13, %p1172_p4  ;;  %s247_s16 = int_to_ptr.vmem [resolvable:$true] %s246_s16 }
  0x14   : > { %s235_s24 = scalar_lea.sflag [#allocation4], %s234_s9  ;;  %s995_s25 = scalar_lea.vmem %s247_s16, 4096 }
  0x15   : > { %p984_p1 = pneg %p1202_p0  ;;  %p996_p2 = scmp.ne.s32.totalorder %s247_s16, %s995_s25 }
  0x16   : > { %s1092_s27 = smov [#allocation3]  }
  0x17   : > { %p998_p3 = pnand %p996_p2, %p984_p1  ;;  %s1000_s29 = sshll.u32 %s1092_s27, 4  ;;  %s1001_s29 = int_to_ptr.vmem [resolvable:$false] %s1000_s29 }
  0x18   : > { %s1002_s11 = scalar_lea.vmem %s1001_s29, 8192  ;;  %p1003_p6 = scmp.lt.s32.totalorder %s247_s16, %s1001_s29 }
  0x19   : > { %p999_p5 = pneg %p998_p3  ;;  %p1004_p7 = scmp.lt.s32.totalorder %s1002_s11, %s995_s25 }
  0x1b   : > { %p1005_p10 = por %p1004_p7, %p1003_p6 }
  0x1d   : > { %p1006_p12 = pnand %p1005_p10, %p999_p5 }
  0x1f   : > { %1009 = shalt.err (!%p1006_p12)
}
  0x20   : > { %s1093_s28 = smov 1024   ;;  %s1094_s9 = smov 512  }
  0x21   : > { %s1095_s10 = smov 32   ;;  %p855_p4 = scmp.ge.s32.totalorder %s1090_s23, 1 }
  0x22   : > { %920 = dma.hbm_to_vmem [thread:$0]  (!%p1202_p0), %s245_s14, 4096, %s247_s16, %s235_s24, %s1093_s28, %s1094_s9, %s1095_s10  }
  0x23   : > { %p254_p13 = scmp.lt.s32.totalorder %s1090_s23, 3 }
  0x25   : > { %p255_p1 = pnand %p855_p4, %p254_p13 }
  0x26   : > { %s1213_s12 = sand.u32 (!%p255_p1), 1, %s1074_s19  }
  0x27   : > { %258 = sbr.rel (%p255_p1) target bundleno = 679 (0x2a7), region = 40  ;;  %s856_s13 = sshll.u32 (!%p255_p1), %s1213_s12, 8 }
  0x28   : > { %s261_s15 = scalar_lea.sflag (!%p255_p1), [#allocation4], %s1213_s12  ;;  %s1217_s25 = scalar_lea.vmem (!%p255_p1), [#allocation3], %s856_s13 }
  0x2c   : > { %1061 = dma.done.wait (%p1178_p8), %s261_s15, 4096  }
  0x2d   : > { %1063 = vsyncadd (%p1178_p8), %s261_s15, 4294963200  ;;  %v331_v0 = vld [vmem:[%s1370_s2 + $0x38] sm:$0xff]  ;;  %v330_v1 = vld [vmem:[%s1370_s2 + $0x30] sm:$0xff]  ;;  %vm332_vm0 = vcmask 523264   ;;  %vm420_vm1 = vcmask 130048   ;;  %v1096_v50 = vmov 0.0  }
  0x2e   : > { %887 = vmatprep.subr.mxu0 %v331_v0  ;;  %v329_v2 = vld [vmem:[%s1370_s2 + $0x28] sm:$0xff]  ;;  %v1235_v3 = vld [vmem:[%s1369_s1] sm:$0xff]  ;;  %v327_v5 = vld [vmem:[%s1370_s2 + $0x18] sm:$0xff]  ;;  %s872_s27 = sshll.u32 %s1082_s21, 9  ;;  %s710_s21 = scalar_lea.sflag [#allocation5], %s1213_s12 }
  0x2f   : > { %888 = vmatpush3.msra.mxu0 %v331_v0  ;;  %903 = vmatprep.mubr.msk.f32.mxu0 %vm332_vm0, %v1235_v3  ;;  %v328_v4 = vld [vmem:[%s1370_s2 + $0x20] sm:$0xff]  ;;  %v326_v6 = vld [vmem:[%s1370_s2 + $0x10] sm:$0xff]  ;;  %v325_v7 = vld [vmem:[%s1370_s2 + $0x8] sm:$0xff]  ;;  %s1320_s28 = scalar_lea.hbm %s1373_s5, %s872_s27  ;;  %s1097_s9 = smov [#allocation6]  }
  0x30   : > { %889 = vmatprep.subr.mxu0 %v330_v1  ;;  %v324_v8 = vld [vmem:[%s1370_s2] sm:$0xff]  ;;  %v1257_v9 = vld [vmem:[%s1369_s1 + $0x8] sm:$0xff]  ;;  %v537_v12 = vld [vmem:[%s1217_s25 + $0xe8] sm:$0xff]  ;;  %s1014_s10 = sshll.u32 %s1097_s9, 4  ;;  %s1015_s10 = int_to_ptr.vmem [resolvable:$false] %s1014_s10 }
  0x31   : > { %890 = vmatpush3.msra.mxu0 %v330_v1  ;;  %v419_v10 = vld [vmem:[%s1371_s3 + $0x8] sm:$0xff]  ;;  %v418_v11 = vld [vmem:[%s1371_s3] sm:$0xff]  ;;  %v536_v22 = vld [vmem:[%s1217_s25 + $0xe0] sm:$0xff]  ;;  %s1016_s13 = scalar_lea.vmem %s1015_s10, 2048 }
  0x32   : > { %891 = vmatprep.subr.mxu0 %v329_v2  ;;  %906 = vmatprep.subr.mxu1 %v419_v10  ;;  %v539_v13 = vld [vmem:[%s1217_s25 + $0xf8] sm:$0xff]  ;;  %v538_v14 = vld [vmem:[%s1217_s25 + $0xf0] sm:$0xff]  ;;  %v533_v23 = vld [vmem:[%s1217_s25 + $0xc8] sm:$0xff] }
  0x33   : > { %892 = vmatpush3.msra.mxu0 %v329_v2  ;;  %907 = vmatpush3.msra.mxu1 %v419_v10  ;;  %v535_v15 = vld [vmem:[%s1217_s25 + $0xd8] sm:$0xff]  ;;  %v414_v17 = vld [vmem:[%s1368_s0] sm:$0xff]  ;;  %v532_v24 = vld [vmem:[%s1217_s25 + $0xc0] sm:$0xff] }
  0x34   : > { %893 = vmatprep.subr.mxu0 %v328_v4  ;;  %908 = vmatprep.subr.mxu1 %v418_v11  ;;  %v415_v18 = vld [vmem:[%s1368_s0 + $0x8] sm:$0xff]  ;;  %v534_v25 = vld [vmem:[%s1217_s25 + $0xd0] sm:$0xff]  ;;  %v529_v26 = vld [vmem:[%s1217_s25 + $0xa8] sm:$0xff] }
  0x35   : > { %894 = vmatpush3.msra.mxu0 %v328_v4  ;;  %909 = vmatpush3.msra.mxu1 %v418_v11  ;;  %v531_v27 = vld [vmem:[%s1217_s25 + $0xb8] sm:$0xff]  ;;  %v528_v28 = vld [vmem:[%s1217_s25 + $0xa0] sm:$0xff]  ;;  %v530_v29 = vld [vmem:[%s1217_s25 + $0xb0] sm:$0xff] }
  0x36   : > { %895 = vmatprep.subr.mxu0 %v327_v5  ;;  %563 = vmatprep.subr.mxu1 %v537_v12  ;;  %v525_v30 = vld [vmem:[%s1217_s25 + $0x88] sm:$0xff]  ;;  %v527_v31 = vld [vmem:[%s1217_s25 + $0x98] sm:$0xff]  ;;  %v524_v32 = vld [vmem:[%s1217_s25 + $0x80] sm:$0xff] }
  0x37   : > { %896 = vmatpush3.msra.mxu0 %v327_v5  ;;  %v526_v33 = vld [vmem:[%s1217_s25 + $0x90] sm:$0xff]  ;;  %v521_v34 = vld [vmem:[%s1217_s25 + $0x68] sm:$0xff]  ;;  %v523_v35 = vld [vmem:[%s1217_s25 + $0x78] sm:$0xff] }
  0x38   : > { %897 = vmatprep.subr.mxu0 %v326_v6  ;;  %v520_v36 = vld [vmem:[%s1217_s25 + $0x60] sm:$0xff]  ;;  %v522_v37 = vld [vmem:[%s1217_s25 + $0x70] sm:$0xff]  ;;  %v517_v38 = vld [vmem:[%s1217_s25 + $0x48] sm:$0xff] }
  0x39   : > { %898 = vmatpush3.msra.mxu0 %v326_v6  ;;  %v519_v39 = vld [vmem:[%s1217_s25 + $0x58] sm:$0xff]  ;;  %v516_v40 = vld [vmem:[%s1217_s25 + $0x40] sm:$0xff]  ;;  %v518_v41 = vld [vmem:[%s1217_s25 + $0x50] sm:$0xff] }
  0x3a   : > { %899 = vmatprep.subr.mxu0 %v325_v7  ;;  %v513_v42 = vld [vmem:[%s1217_s25 + $0x28] sm:$0xff]  ;;  %v515_v43 = vld [vmem:[%s1217_s25 + $0x38] sm:$0xff]  ;;  %v512_v44 = vld [vmem:[%s1217_s25 + $0x20] sm:$0xff] }
  0x3b   : > { %900 = vmatpush3.msra.mxu0 %v325_v7  ;;  %v514_v45 = vld [vmem:[%s1217_s25 + $0x30] sm:$0xff]  ;;  %v509_v46 = vld [vmem:[%s1217_s25 + $0x8] sm:$0xff]  ;;  %v511_v47 = vld [vmem:[%s1217_s25 + $0x18] sm:$0xff] }
  0x3c   : > { %901 = vmatprep.subr.mxu0 %v324_v8  ;;  %v508_v48 = vld [vmem:[%s1217_s25] sm:$0xff]  ;;  %v510_v49 = vld [vmem:[%s1217_s25 + $0x10] sm:$0xff]  ;;  %s857_s25 = sshll.u32 %s1213_s12, 6 }
  0x3d   : > { %902 = vmatpush3.msra.mxu0 %v324_v8  ;;  %s300_s17 = scalar_lea.vmem [#allocation6], %s857_s25 }
  0x3e   : > { %904 = vmatmul.mubr.msk.f32.vlgmr.msra.gmra.mxu0 %vm332_vm0, %v1257_v9  ;;  %640 = vmatprep.subr.mxu0 %v539_v13  ;;  %s727_s24 = sshll.u32 %s300_s17, 4  ;;  %s1315_s24 = int_to_ptr.vmem [resolvable:$true] %s727_s24 }
  0x3f   : > { %641 = vmatpush1.msra.mxu0 %v538_v14  ;;  %688 = vmatprep.mubr.f32.mxu0 %v1096_v50  ;;  %s1010_s30 = scalar_lea.vmem %s1315_s24, 1024  ;;  %p1017_p2 = scmp.lt.s32.totalorder %s1315_s24, %s1015_s10 }
  0x40   : > { %642 = vmatprep.subr.mxu0 %v535_v15  ;;  %p1011_p8 = scmp.ne.s32.totalorder %s1315_s24, %s1010_s30  ;;  %p1018_p3 = scmp.lt.s32.totalorder %s1016_s13, %s1010_s30 }
  0x41   : > { %643 = vmatpush1.msra.mxu0 %v534_v25 }
  0x42   : > { %644 = vmatprep.subr.mxu0 %v531_v27  ;;  %p1012_p12 = pnand %p1011_p8, %p1182_p9  ;;  %p1019_p5 = por %p1018_p3, %p1017_p2 }
  0x43   : > { %645 = vmatpush1.msra.mxu0 %v530_v29 }
  0x44   : > { %646 = vmatprep.subr.mxu0 %v527_v31  ;;  %p1013_p0 = pneg %p1012_p12 }
  0x45   : > { %647 = vmatpush1.msra.mxu0 %v526_v33 }
  0x46   : > { %648 = vmatprep.subr.mxu0 %v523_v35  ;;  %p1020_p6 = pnand %p1019_p5, %p1013_p0 }
  0x47   : > { %649 = vmatpush1.msra.mxu0 %v522_v37 }
  0x48   : > { %650 = vmatprep.subr.mxu0 %v519_v39 }
  0x49   : > { %651 = vmatpush1.msra.mxu0 %v518_v41 }
  0x4a   : > { %652 = vmatprep.subr.mxu0 %v515_v43 }
  0x4b   : > { %653 = vmatpush1.msra.mxu0 %v514_v45 }
  0x4c   : > { %654 = vmatprep.subr.mxu0 %v511_v47 }
  0x4d   : > { %655 = vmatpush1.msra.mxu0 %v510_v49 }
  0xfe   : > { %v905_v16 = vpop.f32.mrf.mxu0 }
  0xff   : > { %v417_v21 = vmul.f32 %v905_v16, %v415_v18 }
 0x100   : > { %v405_v19 = vpop.f32.mrf.mxu0 }
 0x101   : > { %v416_v20 = vmul.f32 %v414_v17, %v405_v19 }
 0x103   : > { %910 = vmatprep.mubr.msk.f32.mxu1 %vm420_vm1, %v416_v20 }
 0x104   : > { %911 = vmatmul.mubr.msk.f32.vlgmr.msra.gmra.mxu1 %vm420_vm1, %v417_v21 }
 0x105   : > { %564 = vmatpush1.msra.mxu1 %v536_v22  ;;  %611 = vmatprep.mubr.f32.mxu1 %v1096_v50 }
 0x106   : > { %565 = vmatprep.subr.mxu1 %v533_v23 }
 0x107   : > { %566 = vmatpush1.msra.mxu1 %v532_v24 }
 0x108   : > { %567 = vmatprep.subr.mxu1 %v529_v26 }
 0x109   : > { %568 = vmatpush1.msra.mxu1 %v528_v28 }
 0x10a   : > { %569 = vmatprep.subr.mxu1 %v525_v30 }
 0x10b   : > { %570 = vmatpush1.msra.mxu1 %v524_v32 }
 0x10c   : > { %571 = vmatprep.subr.mxu1 %v521_v34 }
 0x10d   : > { %572 = vmatpush1.msra.mxu1 %v520_v36 }
 0x10e   : > { %573 = vmatprep.subr.mxu1 %v517_v38 }
 0x10f   : > { %574 = vmatpush1.msra.mxu1 %v516_v40 }
 0x110   : > { %575 = vmatprep.subr.mxu1 %v513_v42 }
 0x111   : > { %576 = vmatpush1.msra.mxu1 %v512_v44 }
 0x112   : > { %577 = vmatprep.subr.mxu1 %v509_v46 }
 0x113   : > { %578 = vmatpush1.msra.mxu1 %v508_v48 }
 0x1c4   : > { %v912_v51 = vpop.f32.mrf.mxu1 }
 0x1c5   : > { %v503_v52 = vadd.f32 %v912_v51, %v1257_v9 }
 0x1c6   : > { %v493_v53 = vpop.f32.mrf.mxu1 }
 0x1c7   : > { %505 = vst.msk [vmem:[#allocation2 + $0x8] sm:$0xff] %vm332_vm0, %v503_v52  ;;  %v502_v54 = vadd.f32 %v493_v53, %v1235_v3 }
 0x1c9   : > { %504 = vst.msk [vmem:[#allocation2] sm:$0xff] %vm332_vm0, %v502_v54 }
 0x1ce   : > { %v507_v56 = vld [vmem:[#allocation2 + $0x8] sm:$0xff] }
 0x1d0   : > { %v506_v55 = vld [vmem:[#allocation2] sm:$0xff] }
 0x1d1   : > { %862 = vmatmul.mubr.msk.f32.vlgmr.msra.gmra.mxu1 %vm332_vm0, %v506_v55  ;;  %864 = vmatmul.mubr.msk.f32.vlgmr.msra.gmra.mxu0 %vm332_vm0, %v506_v55 }
 0x1d2   : > { %617 = vmatprep.mubr.f32.mxu1 %v1096_v50  ;;  %694 = vmatprep.mubr.f32.mxu0 %v1096_v50 }
 0x1d5   : > { %863 = vmatmul.mubr.msk.f32.gmra.mxu1 %vm332_vm0, %v507_v56  ;;  %865 = vmatmul.mubr.msk.f32.gmra.mxu0 %vm332_vm0, %v507_v56 }
 0x291   : > { %v613_v57 = vpop.f32.mrf.mxu1  ;;  %v690_v58 = vpop.f32.mrf.mxu0 }
 0x292   : > { %701 = vst [vmem:[%s300_s17] sm:$0xff] %v613_v57  ;;  %703 = vst [vmem:[%s300_s17 + $0x10] sm:$0xff] %v690_v58 }
 0x293   : > { %v615_v59 = vpop.f32.mrf.mxu1  ;;  %v692_v60 = vpop.f32.mrf.mxu0 }
 0x294   : > { %702 = vst [vmem:[%s300_s17 + $0x8] sm:$0xff] %v615_v59  ;;  %704 = vst [vmem:[%s300_s17 + $0x18] sm:$0xff] %v692_v60 }
 0x295   : > { %v619_v61 = vpop.f32.mrf.mxu1  ;;  %v696_v62 = vpop.f32.mrf.mxu0 }
 0x296   : > { %705 = vst [vmem:[%s300_s17 + $0x20] sm:$0xff] %v619_v61  ;;  %707 = vst [vmem:[%s300_s17 + $0x30] sm:$0xff] %v696_v62 }
 0x297   : > { %v621_v63 = vpop.f32.mrf.mxu1  ;;  %v698_v0 = vpop.f32.mrf.mxu0 }
 0x298   : > { %706 = vst [vmem:[%s300_s17 + $0x28] sm:$0xff] %v621_v63  ;;  %708 = vst [vmem:[%s300_s17 + $0x38] sm:$0xff] %v698_v0 }
 0x299   : > { %1023 = shalt.err (!%p1020_p6)
}
 0x29a   : > { %s1024_s15 = scalar_lea.hbm %s1320_s28, 1024  ;;  %s1028_s25 = scalar_lea.hbm %s1373_s5, 2048 }
 0x29b   : > { %p1025_p7 = scmp.ne.s32.totalorder %s1320_s28, %s1024_s15  ;;  %p1029_p13 = scmp.lt.s32.totalorder %s1320_s28, %s1373_s5 }
 0x29c   : > { %p1030_p1 = scmp.lt.s32.totalorder %s1028_s25, %s1024_s15 }
 0x29d   : > { %p1026_p10 = pnand %p1025_p7, %p1182_p9 }
 0x29e   : > { %p1031_p8 = por %p1030_p1, %p1029_p13 }
 0x29f   : > { %p1027_p4 = pneg %p1026_p10 }
 0x2a1   : > { %p1032_p12 = pnand %p1031_p8, %p1027_p4 }
 0x2a3   : > { %1035 = shalt.err (!%p1032_p12)
}
 0x2a4   : > { %s1098_s29 = smov 512   ;;  %s1099_s11 = smov 1024  }
 0x2a5   : > { %s1100_s30 = smov 32  }
 0x2a6   : > { %915 = dma.vmem_to_hbm [thread:$0]  (%p1182_p9), %s1315_s24, 1024, %s1320_s28, %s710_s21, %s1098_s29, %s1099_s11, %s1100_s30  }
 0x2a7 PF: > { %s742_s9 = sand.u32 1, %s1070_s18   ;;  %p1379_p0 = scmp.ge.s32.totalorder %s1090_s23, 2 }
 0x2a8   : > { %s743_s10 = scalar_lea.sflag [#allocation5], %s742_s9 }
 0x2a9   : > { %p922_p2 = pnand %p1379_p0, %p1189_p11 }
 0x2ab   : > { %p923_p3 = pneg %p922_p2 }
 0x2ad   : > { %1065 = dma.done.wait (%p923_p3), %s743_s10, 1024  }
 0x2ae   : > { %1067 = vsyncadd (%p923_p3), %s743_s10, 4294966272  ;;  %s21_s23 = sadd.s32 1, %s1090_s23   ;;  %s1380_s18 = smov %s1074_s19 }
 0x2af   : > { %p18_p5 = scmp.ge.s32.totalorder %s21_s23, 4   ;;  %s1381_s19 = smov %s1078_s20 }
 0x2b0   : > { %s1382_s20 = smov %s1187_s7  ;;  %s1383_s21 = smov %s1086_s22 }
 0x2b1   : > { %s1384_s22 = smov %s1386_s26  ;;  %20 = sbr.rel (!%p18_p5) target bundleno = 6 (0x6), region = 95 }
 0x2b6   :  { %748 = vsyncpa [#allocation4], 1 }
 0x2b7   :  { %750 = vsyncpa [#allocation4 + $0x1], 1 }
 0x2b8   :  { %751 = vsyncpa [#allocation5], 1 }
 0x2b9   :  { %753 = vsyncpa [#allocation5 + $0x1], 1 }

</bundles_post_ra>
